<compile_context>
chip_gen: v7x
topology: tpu7x:2x2x1
jax: 0.10.0
libtpu: 0.0.40
codegen_flags: <defaults>
</compile_context>

<pallas_src>
import functools

import jax
import jax.numpy as jnp
from jax import lax
from jax.experimental import pallas as pl
from jax.experimental.pallas import tpu as pltpu

_EPS_SQ = 1e-24  # (F.normalize eps = 1e-12) squared


def _fused_kernel(s_ref, t_ref, out_ref,
                  s_rs, t_rs, alpha, s_shift_buf, s_lse, y_acc, loss_acc,
                  *, temperature, n_rows, n_teachers, n_row_tiles):
    p = pl.program_id(0)   # 0 = attention-logit pass, 1 = mixture + KL pass
    r = pl.program_id(1)   # row tile
    k = pl.program_id(2)   # teacher index
    inv_t = 1.0 / temperature
    last_r = n_row_tiles - 1
    last_k = n_teachers - 1

    # ---------------- pass 0: alpha_k = mean(norm(s) @ norm(t_k).T) ----------------
    # Using mean(A @ B.T) = dot(rowsum(A), rowsum(B)) / N^2 (no N x N matmul).
    @pl.when(p == 0)
    def _pass0():
        @pl.when(jnp.logical_and(r == 0, k == 0))
        def _init():
            s_rs[...] = jnp.zeros_like(s_rs)
            t_rs[...] = jnp.zeros_like(t_rs)
            loss_acc[...] = jnp.zeros_like(loss_acc)

        # Student normalized row-sum: once per row tile (hoisted out of the k loop).
        @pl.when(k == 0)
        def _student_rowsum():
            s = s_ref[...]
            s_n = s * lax.rsqrt(
                jnp.maximum(jnp.sum(s * s, axis=-1, keepdims=True), _EPS_SQ))
            s_rs[...] += jnp.sum(s_n, axis=0, keepdims=True)

        t = t_ref[0]
        t_n = t * lax.rsqrt(
            jnp.maximum(jnp.sum(t * t, axis=-1, keepdims=True), _EPS_SQ))
        t_rs[k] += jnp.sum(t_n, axis=0, keepdims=True)

        # End of pass 0: raw alphas -> normalize by sum -> softmax (matches torch `at`).
        @pl.when(jnp.logical_and(r == last_r, k == last_k))
        def _alphas():
            raw = jnp.sum(s_rs[...] * t_rs[...], axis=-1, keepdims=True)  # (K,1,1)
            raw = raw * (1.0 / (n_rows * n_rows))                          # the mean
            a = raw / jnp.sum(raw)                                         # alphas /= sum
            a = a - jnp.max(a)
            e = jnp.exp(a)
            alpha[...] = e / jnp.sum(e)                                    # softmax

    # ---------------- pass 1: y_soft = sum_k alpha_k * t_k, then KL ----------------
    @pl.when(p == 1)
    def _pass1():
        # Student-side prep hoisted to k==0 so it overlaps the teacher DMAs.
        @pl.when(k == 0)
        def _student_prep():
            s = s_ref[...] * inv_t
            s_sh = s - jnp.max(s, axis=-1, keepdims=True)
            s_shift_buf[...] = s_sh
            s_lse[...] = jnp.log(jnp.sum(jnp.exp(s_sh), axis=-1, keepdims=True))
            y_acc[...] = jnp.zeros_like(y_acc)

        y_acc[...] += alpha[k] * t_ref[0]

        @pl.when(k == last_k)
        def _kl_epilogue():
            y = y_acc[...] * inv_t
            y_sh = y - jnp.max(y, axis=-1, keepdims=True)
            e_y = jnp.exp(y_sh)                                   # reused (no exp(t_log))
            z_y = jnp.sum(e_y, axis=-1, keepdims=True)
            cross = jnp.sum(e_y * (y_sh - s_shift_buf[...]), axis=-1, keepdims=True)
            # KL_row = E_p[y_shift - s_shift] + (logZ_s - logZ_y)
            # Exact per-row divide (NOT approx=True reciprocal): the two terms
            # largely cancel, so approximate rcp error gets amplified.
            kl_row = cross / z_y + (s_lse[...] - jnp.log(z_y))
            loss_acc[...] += jnp.sum(kl_row).reshape(1, 1)

            @pl.when(r == last_r)
            def _write_out():
                out_ref[...] = loss_acc[...] * (temperature * temperature / n_rows)


def _pick_row_tile(n, c):
    """Largest row tile (multiple of 8 dividing N, or N itself) that keeps the
    f32 working set (~7 tile x C buffers: double-buffered inputs + scratch)
    under ~12 MiB, so defaults fit v5e's 16 MiB scoped VMEM and v7x's budget."""
    budget_rows = (12 * 1024 * 1024) // (7 * 4 * max(c, 1))
    budget_rows = max(8, min(budget_rows, 2048))
    if n <= budget_rows:
        return n
    t = (budget_rows // 8) * 8
    while t >= 8:
        if n % t == 0:
            return t
        t -= 8
    return n  # fallback: single full-rows tile


def multi_kl_distiller(s_output, t_outputs, temperature=1.0):
    """Pallas implementation of MultiKLDistiller(T=temperature).forward(..., agg='attn').

    Works for a single teacher too (the 'attn' weights degenerate to [1.0], matching
    the len(t_output) == 1 branch of the PyTorch forward).
    """
    # TODO(synk): only the default agg='attn' (and equivalent single-teacher) path is
    # implemented; agg='learnable_attn' trains an AttentionMechanism in-place and has
    # no clean Pallas-kernel equivalent.
    t_stack = jnp.stack(t_outputs, axis=0).astype(jnp.float32)
    s = s_output.astype(jnp.float32)
    K, N, C = t_stack.shape

    tile_n = _pick_row_tile(N, C)
    n_row_tiles = N // tile_n

    kernel = functools.partial(
        _fused_kernel, temperature=float(temperature), n_rows=N,
        n_teachers=K, n_row_tiles=n_row_tiles)

    loss = pl.pallas_call(
        kernel,
        out_shape=jax.ShapeDtypeStruct((1, 1), jnp.float32),
        grid=(2, n_row_tiles, K),
        in_specs=[
            pl.BlockSpec((tile_n, C), lambda p, r, k: (r, 0)),       # student rows
            pl.BlockSpec((1, tile_n, C), lambda p, r, k: (k, r, 0)),  # teacher k rows
        ],
        out_specs=pl.BlockSpec((1, 1), lambda p, r, k: (0, 0)),
        scratch_shapes=[
            pltpu.VMEM((1, C), jnp.float32),        # s_rs   : rowsum of norm(student)
            pltpu.VMEM((K, 1, C), jnp.float32),     # t_rs   : rowsums of norm(teachers)
            pltpu.VMEM((K, 1, 1), jnp.float32),     # alpha  : softmax attention weights
            pltpu.VMEM((tile_n, C), jnp.float32),   # s_shift: s/T - rowmax (pass 1)
            pltpu.VMEM((tile_n, 1), jnp.float32),   # s_lse  : log-sum-exp of student
            pltpu.VMEM((tile_n, C), jnp.float32),   # y_acc  : alpha-weighted teacher mix
            pltpu.VMEM((1, 1), jnp.float32),        # loss_acc
        ],
        compiler_params=pltpu.CompilerParams(
            dimension_semantics=("arbitrary", "arbitrary", "arbitrary")),
    )(s, t_stack)
    return loss[0, 0]


def _reference(s, t_list, T=1.0):
    """Pure-JAX reference mirroring the PyTorch forward (agg='attn')."""
    t_stack = jnp.stack(t_list, axis=0)
    s_n = s / jnp.maximum(jnp.linalg.norm(s, axis=1, keepdims=True), 1e-12)
    t_n = t_stack / jnp.maximum(jnp.linalg.norm(t_stack, axis=2, keepdims=True), 1e-12)
    sims = jnp.einsum("nc,kmc->knm", s_n, t_n)
    alphas = sims.mean(axis=(1, 2))
    alphas = alphas / alphas.sum()
    alphas = jax.nn.softmax(alphas, axis=0)
    y_soft = jnp.einsum("k,knc->nc", alphas, t_stack)
    s_log = jax.nn.log_softmax(s / T, axis=-1)
    t_log = jax.nn.log_softmax(y_soft / T, axis=-1)
    return jnp.sum(jnp.exp(t_log) * (t_log - s_log)) / s.shape[0] * (T * T)


if __name__ == "__main__":
    key = jax.random.PRNGKey(0)
    N, C, K = 8, 32, 3  # samples, classes, number of teachers
    T = 2.0
    keys = jax.random.split(key, K + 1)
    s_output = jax.random.normal(keys[0], (N, C), dtype=jnp.float32)
    # Teachers correlated with the student (realistic distillation data; also keeps
    # the module's alphas /= alphas.sum() normalization well-conditioned).
    t_outputs = [s_output + 0.5 * jax.random.normal(keys[i + 1], (N, C), dtype=jnp.float32)
                 for i in range(K)]

    loss = multi_kl_distiller(s_output, t_outputs, temperature=T)
    loss = jax.block_until_ready(loss)
    ref = _reference(s_output, t_outputs, T=T)
    # rtol covers the exact-but-reassociated row-sum rewrite (errors ~1e-6 rel).
    assert jnp.allclose(loss, ref, rtol=1e-3, atol=1e-5), (float(loss), float(ref))

    # Single-teacher path (matches the len(t_output) == 1 branch of the module).
    loss1 = multi_kl_distiller(s_output, t_outputs[:1], temperature=1.0)
    loss1 = jax.block_until_ready(loss1)
    ref1 = _reference(s_output, t_outputs[:1], T=1.0)
    assert jnp.allclose(loss1, ref1, rtol=1e-3, atol=1e-5), (float(loss1), float(ref1))

    print("KERNEL_OK")
</pallas_src>

<mosaic_0001>
module attributes {stable_mosaic.version = 11 : i64} {
  func.func @_fused_kernel(%arg0: i32, %arg1: i32, %arg2: i32, %arg3: memref<8x32xf32, #tpu.memory_space<vmem>>, %arg4: memref<1x8x32xf32, #tpu.memory_space<vmem>>, %arg5: memref<1x1xf32, #tpu.memory_space<vmem>>, %arg6: memref<1x32xf32, #tpu.memory_space<vmem>>, %arg7: memref<3x1x32xf32, #tpu.memory_space<vmem>>, %arg8: memref<3x1x1xf32, #tpu.memory_space<vmem>>, %arg9: memref<8x32xf32, #tpu.memory_space<vmem>>, %arg10: memref<8x1xf32, #tpu.memory_space<vmem>>, %arg11: memref<8x32xf32, #tpu.memory_space<vmem>>, %arg12: memref<1x1xf32, #tpu.memory_space<vmem>>) attributes {dimension_semantics = [#tpu.dimension_semantics<arbitrary>, #tpu.dimension_semantics<arbitrary>, #tpu.dimension_semantics<arbitrary>], iteration_bounds = array<i64: 2, 1, 3>, scalar_prefetch = 0 : i64, scratch_operands = 7 : i64, tpu.core_type = #tpu.core_type<tc>, window_params = [{transform_indices = @transform_0, window_bounds = array<i64: 8, 32>}, {transform_indices = @transform_1, window_bounds = array<i64: 1, 8, 32>}, {pipeline_mode = #tpu.pipeline_mode<synchronous>, transform_indices = @transform_2, window_bounds = array<i64: 1, 1>}]} {
    %c0_i32 = arith.constant 0 : i32
    %0 = arith.cmpi eq, %arg0, %c0_i32 : i32
    %1 = arith.extui %0 : i1 to i32
    %c0_i32_0 = arith.constant 0 : i32
    %2 = arith.cmpi ne, %1, %c0_i32_0 : i32
    scf.if %2 {
      %c0_i32_2 = arith.constant 0 : i32
      %6 = arith.cmpi eq, %arg1, %c0_i32_2 : i32
      %c0_i32_3 = arith.constant 0 : i32
      %7 = arith.cmpi eq, %arg2, %c0_i32_3 : i32
      %8 = arith.andi %6, %7 : i1
      %9 = arith.extui %8 : i1 to i32
      %c0_i32_4 = arith.constant 0 : i32
      %10 = arith.cmpi ne, %9, %c0_i32_4 : i32
      scf.if %10 {
        %cst_17 = arith.constant 0.000000e+00 : f32
        %39 = vector.broadcast %cst_17 : f32 to vector<1x32xf32>
        %c0_18 = arith.constant 0 : index
        %c0_19 = arith.constant 0 : index
        %40 = vector.load %arg6[%c0_18, %c0_19] : memref<1x32xf32, #tpu.memory_space<vmem>>, vector<1x32xf32>
        tpu.vector_store %arg6[%c0_18, %c0_19], %39 {strides = array<i32>} : memref<1x32xf32, #tpu.memory_space<vmem>>, vector<1x32xf32>,
        %cst_20 = arith.constant 0.000000e+00 : f32
        %41 = vector.broadcast %cst_20 : f32 to vector<3x1x32xf32>
        %c0_21 = arith.constant 0 : index
        %c0_22 = arith.constant 0 : index
        %c0_23 = arith.constant 0 : index
        %42 = vector.load %arg7[%c0_21, %c0_22, %c0_23] : memref<3x1x32xf32, #tpu.memory_space<vmem>>, vector<3x1x32xf32>
        tpu.vector_store %arg7[%c0_21, %c0_22, %c0_23], %41 {strides = array<i32>} : memref<3x1x32xf32, #tpu.memory_space<vmem>>, vector<3x1x32xf32>,
        %cst_24 = arith.constant 0.000000e+00 : f32
        %43 = vector.broadcast %cst_24 : f32 to vector<1x1xf32>
        %c0_25 = arith.constant 0 : index
        %c0_26 = arith.constant 0 : index
        %44 = vector.load %arg12[%c0_25, %c0_26] : memref<1x1xf32, #tpu.memory_space<vmem>>, vector<1x1xf32>
        tpu.vector_store %arg12[%c0_25, %c0_26], %43 {strides = array<i32>} : memref<1x1xf32, #tpu.memory_space<vmem>>, vector<1x1xf32>,
      } else {
      }
      %c0_i32_5 = arith.constant 0 : i32
      %11 = arith.cmpi eq, %arg2, %c0_i32_5 : i32
      %12 = arith.extui %11 : i1 to i32
      %c0_i32_6 = arith.constant 0 : i32
      %13 = arith.cmpi ne, %12, %c0_i32_6 : i32
      scf.if %13 {
        %c0_17 = arith.constant 0 : index
        %c0_18 = arith.constant 0 : index
        %39 = vector.load %arg3[%c0_17, %c0_18] : memref<8x32xf32, #tpu.memory_space<vmem>>, vector<8x32xf32>
        %40 = arith.mulf %39, %39 : vector<8x32xf32>
        %cst_19 = arith.constant dense<0.000000e+00> : vector<8xf32>
        %41 = vector.multi_reduction <add>, %40, %cst_19 [1] : vector<8x32xf32> to vector<8xf32>
        %42 = vector.shape_cast %41 : vector<8xf32> to vector<8x1xf32>
        %cst_20 = arith.constant 1.000000e-24 : f32
        %43 = vector.broadcast %cst_20 : f32 to vector<8x1xf32>
        %44 = arith.maximumf %42, %43 : vector<8x1xf32>
        %45 = math.rsqrt %44 : vector<8x1xf32>
        %46 = vector.broadcast %45 : vector<8x1xf32> to vector<8x32xf32>
        %47 = arith.mulf %39, %46 : vector<8x32xf32>
        %c0_21 = arith.constant 0 : index
        %c0_22 = arith.constant 0 : index
        %48 = vector.load %arg6[%c0_21, %c0_22] : memref<1x32xf32, #tpu.memory_space<vmem>>, vector<1x32xf32>
        %cst_23 = arith.constant dense<0.000000e+00> : vector<32xf32>
        %49 = vector.multi_reduction <add>, %47, %cst_23 [0] : vector<8x32xf32> to vector<32xf32>
        %50 = vector.shape_cast %49 : vector<32xf32> to vector<1x32xf32>
        %51 = arith.addf %48, %50 : vector<1x32xf32>
        %c0_24 = arith.constant 0 : index
        %c0_25 = arith.constant 0 : index
        %52 = vector.load %arg6[%c0_24, %c0_25] : memref<1x32xf32, #tpu.memory_space<vmem>>, vector<1x32xf32>
        tpu.vector_store %arg6[%c0_24, %c0_25], %51 {strides = array<i32>} : memref<1x32xf32, #tpu.memory_space<vmem>>, vector<1x32xf32>,
      } else {
      }
      %c0 = arith.constant 0 : index
      %c0_7 = arith.constant 0 : index
      %c0_8 = arith.constant 0 : index
      %14 = vector.load %arg4[%c0, %c0_7, %c0_8] : memref<1x8x32xf32, #tpu.memory_space<vmem>>, vector<1x8x32xf32>
      %15 = vector.shape_cast %14 : vector<1x8x32xf32> to vector<8x32xf32>
      %16 = arith.mulf %15, %15 : vector<8x32xf32>
      %cst = arith.constant dense<0.000000e+00> : vector<8xf32>
      %17 = vector.multi_reduction <add>, %16, %cst [1] : vector<8x32xf32> to vector<8xf32>
      %18 = vector.shape_cast %17 : vector<8xf32> to vector<8x1xf32>
      %cst_9 = arith.constant 1.000000e-24 : f32
      %19 = vector.broadcast %cst_9 : f32 to vector<8x1xf32>
      %20 = arith.maximumf %18, %19 : vector<8x1xf32>
      %21 = math.rsqrt %20 : vector<8x1xf32>
      %22 = vector.broadcast %21 : vector<8x1xf32> to vector<8x32xf32>
      %23 = arith.mulf %15, %22 : vector<8x32xf32>
      %24 = arith.index_cast %arg2 : i32 to index
      %c0_10 = arith.constant 0 : index
      %c0_11 = arith.constant 0 : index
      %25 = vector.load %arg7[%24, %c0_10, %c0_11] : memref<3x1x32xf32, #tpu.memory_space<vmem>>, vector<1x1x32xf32>
      %26 = vector.shape_cast %25 : vector<1x1x32xf32> to vector<1x32xf32>
      %cst_12 = arith.constant dense<0.000000e+00> : vector<32xf32>
      %27 = vector.multi_reduction <add>, %23, %cst_12 [0] : vector<8x32xf32> to vector<32xf32>
      %28 = vector.shape_cast %27 : vector<32xf32> to vector<1x32xf32>
      %29 = arith.addf %26, %28 : vector<1x32xf32>
      %30 = arith.index_cast %arg2 : i32 to index
      %c0_13 = arith.constant 0 : index
      %c0_14 = arith.constant 0 : index
      %31 = vector.load %arg7[%30, %c0_13, %c0_14] : memref<3x1x32xf32, #tpu.memory_space<vmem>>, vector<1x1x32xf32>
      %32 = vector.shape_cast %31 : vector<1x1x32xf32> to vector<1x32xf32>
      %33 = vector.shape_cast %29 : vector<1x32xf32> to vector<1x1x32xf32>
      tpu.vector_store %arg7[%30, %c0_13, %c0_14], %33 {strides = array<i32>} : memref<3x1x32xf32, #tpu.memory_space<vmem>>, vector<1x1x32xf32>,
      %c0_i32_15 = arith.constant 0 : i32
      %34 = arith.cmpi eq, %arg1, %c0_i32_15 : i32
      %c2_i32 = arith.constant 2 : i32
      %35 = arith.cmpi eq, %arg2, %c2_i32 : i32
      %36 = arith.andi %34, %35 : i1
      %37 = arith.extui %36 : i1 to i32
      %c0_i32_16 = arith.constant 0 : i32
      %38 = arith.cmpi ne, %37, %c0_i32_16 : i32
      scf.if %38 {
        %c0_17 = arith.constant 0 : index
        %c0_18 = arith.constant 0 : index
        %39 = vector.load %arg6[%c0_17, %c0_18] : memref<1x32xf32, #tpu.memory_space<vmem>>, vector<1x32xf32>
        %c0_19 = arith.constant 0 : index
        %c0_20 = arith.constant 0 : index
        %c0_21 = arith.constant 0 : index
        %40 = vector.load %arg7[%c0_19, %c0_20, %c0_21] : memref<3x1x32xf32, #tpu.memory_space<vmem>>, vector<3x1x32xf32>
        %41 = vector.shape_cast %39 : vector<1x32xf32> to vector<1x1x32xf32>
        %42 = vector.broadcast %41 : vector<1x1x32xf32> to vector<3x1x32xf32>
        %43 = arith.mulf %42, %40 : vector<3x1x32xf32>
        %cst_22 = arith.constant dense<0.000000e+00> : vector<3x1xf32>
        %44 = vector.multi_reduction <add>, %43, %cst_22 [2] : vector<3x1x32xf32> to vector<3x1xf32>
        %45 = vector.shape_cast %44 : vector<3x1xf32> to vector<3x1x1xf32>
        %cst_23 = arith.constant 1.562500e-02 : f32
        %46 = vector.broadcast %cst_23 : f32 to vector<3x1x1xf32>
        %47 = arith.mulf %45, %46 : vector<3x1x1xf32>
        %48 = vector.shape_cast %47 : vector<3x1x1xf32> to vector<1x3x1x1xf32>
        %cst_24 = arith.constant dense<0.000000e+00> : vector<1xf32>
        %49 = vector.multi_reduction <add>, %48, %cst_24 [1, 2, 3] : vector<1x3x1x1xf32> to vector<1xf32>
        %50 = vector.shape_cast %49 : vector<1xf32> to vector<1x1x1x1xf32>
        %51 = vector.extract %50[0, 0, 0, 0] : f32 from vector<1x1x1x1xf32>
        %52 = vector.broadcast %51 : f32 to vector<3x1x1xf32>
        %53 = arith.divf %47, %52 : vector<3x1x1xf32>
        %54 = vector.shape_cast %53 : vector<3x1x1xf32> to vector<1x3x1x1xf32>
        %cst_25 = arith.constant dense<0xFF800000> : vector<1xf32>
        %55 = vector.multi_reduction <maximumf>, %54, %cst_25 [1, 2, 3] : vector<1x3x1x1xf32> to vector<1xf32>
        %56 = vector.shape_cast %55 : vector<1xf32> to vector<1x1x1x1xf32>
        %57 = vector.extract %56[0, 0, 0, 0] : f32 from vector<1x1x1x1xf32>
        %58 = vector.broadcast %57 : f32 to vector<3x1x1xf32>
        %59 = arith.subf %53, %58 : vector<3x1x1xf32>
        %60 = math.exp %59 : vector<3x1x1xf32>
        %61 = vector.shape_cast %60 : vector<3x1x1xf32> to vector<1x3x1x1xf32>
        %cst_26 = arith.constant dense<0.000000e+00> : vector<1xf32>
        %62 = vector.multi_reduction <add>, %61, %cst_26 [1, 2, 3] : vector<1x3x1x1xf32> to vector<1xf32>
        %63 = vector.shape_cast %62 : vector<1xf32> to vector<1x1x1x1xf32>
        %64 = vector.extract %63[0, 0, 0, 0] : f32 from vector<1x1x1x1xf32>
        %65 = vector.broadcast %64 : f32 to vector<3x1x1xf32>
        %66 = arith.divf %60, %65 : vector<3x1x1xf32>
        %c0_27 = arith.constant 0 : index
        %c0_28 = arith.constant 0 : index
        %c0_29 = arith.constant 0 : index
        %67 = vector.load %arg8[%c0_27, %c0_28, %c0_29] : memref<3x1x1xf32, #tpu.memory_space<vmem>>, vector<3x1x1xf32>
        tpu.vector_store %arg8[%c0_27, %c0_28, %c0_29], %66 {strides = array<i32>} : memref<3x1x1xf32, #tpu.memory_space<vmem>>, vector<3x1x1xf32>,
      } else {
      }
    } else {
    }
    %c1_i32 = arith.constant 1 : i32
    %3 = arith.cmpi eq, %arg0, %c1_i32 : i32
    %4 = arith.extui %3 : i1 to i32
    %c0_i32_1 = arith.constant 0 : i32
    %5 = arith.cmpi ne, %4, %c0_i32_1 : i32
    scf.if %5 {
      %c0_i32_2 = arith.constant 0 : i32
      %6 = arith.cmpi eq, %arg2, %c0_i32_2 : i32
      %7 = arith.extui %6 : i1 to i32
      %c0_i32_3 = arith.constant 0 : i32
      %8 = arith.cmpi ne, %7, %c0_i32_3 : i32
      scf.if %8 {
        %c0_13 = arith.constant 0 : index
        %c0_14 = arith.constant 0 : index
        %22 = vector.load %arg3[%c0_13, %c0_14] : memref<8x32xf32, #tpu.memory_space<vmem>>, vector<8x32xf32>
        %cst = arith.constant 5.000000e-01 : f32
        %23 = vector.broadcast %cst : f32 to vector<8x32xf32>
        %24 = arith.mulf %22, %23 : vector<8x32xf32>
        %cst_15 = arith.constant dense<0xFF800000> : vector<8xf32>
        %25 = vector.multi_reduction <maximumf>, %24, %cst_15 [1] : vector<8x32xf32> to vector<8xf32>
        %26 = vector.shape_cast %25 : vector<8xf32> to vector<8x1xf32>
        %27 = vector.broadcast %26 : vector<8x1xf32> to vector<8x32xf32>
        %28 = arith.subf %24, %27 : vector<8x32xf32>
        %c0_16 = arith.constant 0 : index
        %c0_17 = arith.constant 0 : index
        %29 = vector.load %arg9[%c0_16, %c0_17] : memref<8x32xf32, #tpu.memory_space<vmem>>, vector<8x32xf32>
        tpu.vector_store %arg9[%c0_16, %c0_17], %28 {strides = array<i32>} : memref<8x32xf32, #tpu.memory_space<vmem>>, vector<8x32xf32>,
        %30 = math.exp %28 : vector<8x32xf32>
        %cst_18 = arith.constant dense<0.000000e+00> : vector<8xf32>
        %31 = vector.multi_reduction <add>, %30, %cst_18 [1] : vector<8x32xf32> to vector<8xf32>
        %32 = vector.shape_cast %31 : vector<8xf32> to vector<8x1xf32>
        %33 = math.log %32 : vector<8x1xf32>
        %c0_19 = arith.constant 0 : index
        %c0_20 = arith.constant 0 : index
        %34 = vector.load %arg10[%c0_19, %c0_20] : memref<8x1xf32, #tpu.memory_space<vmem>>, vector<8x1xf32>
        tpu.vector_store %arg10[%c0_19, %c0_20], %33 {strides = array<i32>} : memref<8x1xf32, #tpu.memory_space<vmem>>, vector<8x1xf32>,
        %cst_21 = arith.constant 0.000000e+00 : f32
        %35 = vector.broadcast %cst_21 : f32 to vector<8x32xf32>
        %c0_22 = arith.constant 0 : index
        %c0_23 = arith.constant 0 : index
        %36 = vector.load %arg11[%c0_22, %c0_23] : memref<8x32xf32, #tpu.memory_space<vmem>>, vector<8x32xf32>
        tpu.vector_store %arg11[%c0_22, %c0_23], %35 {strides = array<i32>} : memref<8x32xf32, #tpu.memory_space<vmem>>, vector<8x32xf32>,
      } else {
      }
      %c0 = arith.constant 0 : index
      %c0_4 = arith.constant 0 : index
      %9 = vector.load %arg11[%c0, %c0_4] : memref<8x32xf32, #tpu.memory_space<vmem>>, vector<8x32xf32>
      %10 = arith.index_cast %arg2 : i32 to index
      %c0_5 = arith.constant 0 : index
      %c0_6 = arith.constant 0 : index
      %11 = vector.load %arg8[%10, %c0_5, %c0_6] : memref<3x1x1xf32, #tpu.memory_space<vmem>>, vector<1x1x1xf32>
      %12 = vector.shape_cast %11 : vector<1x1x1xf32> to vector<1x1xf32>
      %c0_7 = arith.constant 0 : index
      %c0_8 = arith.constant 0 : index
      %c0_9 = arith.constant 0 : index
      %13 = vector.load %arg4[%c0_7, %c0_8, %c0_9] : memref<1x8x32xf32, #tpu.memory_space<vmem>>, vector<1x8x32xf32>
      %14 = vector.shape_cast %13 : vector<1x8x32xf32> to vector<8x32xf32>
      %15 = vector.broadcast %12 : vector<1x1xf32> to vector<8x32xf32>
      %16 = arith.mulf %15, %14 : vector<8x32xf32>
      %17 = arith.addf %9, %16 : vector<8x32xf32>
      %c0_10 = arith.constant 0 : index
      %c0_11 = arith.constant 0 : index
      %18 = vector.load %arg11[%c0_10, %c0_11] : memref<8x32xf32, #tpu.memory_space<vmem>>, vector<8x32xf32>
      tpu.vector_store %arg11[%c0_10, %c0_11], %17 {strides = array<i32>} : memref<8x32xf32, #tpu.memory_space<vmem>>, vector<8x32xf32>,
      %c2_i32 = arith.constant 2 : i32
      %19 = arith.cmpi eq, %arg2, %c2_i32 : i32
      %20 = arith.extui %19 : i1 to i32
      %c0_i32_12 = arith.constant 0 : i32
      %21 = arith.cmpi ne, %20, %c0_i32_12 : i32
      scf.if %21 {
        %c0_13 = arith.constant 0 : index
        %c0_14 = arith.constant 0 : index
        %22 = vector.load %arg11[%c0_13, %c0_14] : memref<8x32xf32, #tpu.memory_space<vmem>>, vector<8x32xf32>
        %cst = arith.constant 5.000000e-01 : f32
        %23 = vector.broadcast %cst : f32 to vector<8x32xf32>
        %24 = arith.mulf %22, %23 : vector<8x32xf32>
        %cst_15 = arith.constant dense<0xFF800000> : vector<8xf32>
        %25 = vector.multi_reduction <maximumf>, %24, %cst_15 [1] : vector<8x32xf32> to vector<8xf32>
        %26 = vector.shape_cast %25 : vector<8xf32> to vector<8x1xf32>
        %27 = vector.broadcast %26 : vector<8x1xf32> to vector<8x32xf32>
        %28 = arith.subf %24, %27 : vector<8x32xf32>
        %29 = math.exp %28 : vector<8x32xf32>
        %cst_16 = arith.constant dense<0.000000e+00> : vector<8xf32>
        %30 = vector.multi_reduction <add>, %29, %cst_16 [1] : vector<8x32xf32> to vector<8xf32>
        %31 = vector.shape_cast %30 : vector<8xf32> to vector<8x1xf32>
        %c0_17 = arith.constant 0 : index
        %c0_18 = arith.constant 0 : index
        %32 = vector.load %arg9[%c0_17, %c0_18] : memref<8x32xf32, #tpu.memory_space<vmem>>, vector<8x32xf32>
        %33 = arith.subf %28, %32 : vector<8x32xf32>
        %34 = arith.mulf %29, %33 : vector<8x32xf32>
        %cst_19 = arith.constant dense<0.000000e+00> : vector<8xf32>
        %35 = vector.multi_reduction <add>, %34, %cst_19 [1] : vector<8x32xf32> to vector<8xf32>
        %36 = vector.shape_cast %35 : vector<8xf32> to vector<8x1xf32>
        %37 = arith.divf %36, %31 : vector<8x1xf32>
        %c0_20 = arith.constant 0 : index
        %c0_21 = arith.constant 0 : index
        %38 = vector.load %arg10[%c0_20, %c0_21] : memref<8x1xf32, #tpu.memory_space<vmem>>, vector<8x1xf32>
        %39 = math.log %31 : vector<8x1xf32>
        %40 = arith.subf %38, %39 : vector<8x1xf32>
        %41 = arith.addf %37, %40 : vector<8x1xf32>
        %c0_22 = arith.constant 0 : index
        %c0_23 = arith.constant 0 : index
        %42 = vector.load %arg12[%c0_22, %c0_23] : memref<1x1xf32, #tpu.memory_space<vmem>>, vector<1x1xf32>
        %43 = vector.shape_cast %41 : vector<8x1xf32> to vector<1x8x1xf32>
        %cst_24 = arith.constant dense<0.000000e+00> : vector<1xf32>
        %44 = vector.multi_reduction <add>, %43, %cst_24 [1, 2] : vector<1x8x1xf32> to vector<1xf32>
        %45 = vector.shape_cast %44 : vector<1xf32> to vector<1x1x1xf32>
        %46 = vector.extract %45[0, 0, 0] : f32 from vector<1x1x1xf32>
        %47 = vector.broadcast %46 : f32 to vector<1x1xf32>
        %48 = arith.addf %42, %47 : vector<1x1xf32>
        %c0_25 = arith.constant 0 : index
        %c0_26 = arith.constant 0 : index
        %49 = vector.load %arg12[%c0_25, %c0_26] : memref<1x1xf32, #tpu.memory_space<vmem>>, vector<1x1xf32>
        tpu.vector_store %arg12[%c0_25, %c0_26], %48 {strides = array<i32>} : memref<1x1xf32, #tpu.memory_space<vmem>>, vector<1x1xf32>,
        %c0_i32_27 = arith.constant 0 : i32
        %50 = arith.cmpi eq, %arg1, %c0_i32_27 : i32
        %51 = arith.extui %50 : i1 to i32
        %c0_i32_28 = arith.constant 0 : i32
        %52 = arith.cmpi ne, %51, %c0_i32_28 : i32
        scf.if %52 {
          %c0_29 = arith.constant 0 : index
          %c0_30 = arith.constant 0 : index
          %53 = vector.load %arg12[%c0_29, %c0_30] : memref<1x1xf32, #tpu.memory_space<vmem>>, vector<1x1xf32>
          %cst_31 = arith.constant 5.000000e-01 : f32
          %54 = vector.broadcast %cst_31 : f32 to vector<1x1xf32>
          %55 = arith.mulf %53, %54 : vector<1x1xf32>
          %c0_32 = arith.constant 0 : index
          %c0_33 = arith.constant 0 : index
          %56 = vector.load %arg5[%c0_32, %c0_33] : memref<1x1xf32, #tpu.memory_space<vmem>>, vector<1x1xf32>
          tpu.vector_store %arg5[%c0_32, %c0_33], %55 {strides = array<i32>} : memref<1x1xf32, #tpu.memory_space<vmem>>, vector<1x1xf32>,
        } else {
        }
      } else {
      }
    } else {
    }
    return
  }
  func.func @transform_0(%arg0: i32, %arg1: i32, %arg2: i32) -> (i32, i32) {
    %c0_i32 = arith.constant 0 : i32
    %c0_i32_0 = arith.constant 0 : i32
    return %arg1, %c0_i32 : i32, i32
  }
  func.func @transform_1(%arg0: i32, %arg1: i32, %arg2: i32) -> (i32, i32, i32) {
    %c0_i32 = arith.constant 0 : i32
    %c0_i32_0 = arith.constant 0 : i32
    return %arg2, %arg1, %c0_i32 : i32, i32, i32
  }
  func.func @transform_2(%arg0: i32, %arg1: i32, %arg2: i32) -> (i32, i32) {
    %c0_i32 = arith.constant 0 : i32
    %c0_i32_0 = arith.constant 0 : i32
    %c0_i32_1 = arith.constant 0 : i32
    return %c0_i32, %c0_i32_0 : i32, i32
  }
}

</mosaic_0001>

<bundles_post_ra>
// kernel: tpu_custom_call.1
= control target key start
LH: loop header
LB: loop body
LE: loop exit
PB: predicated region body
PF: predicated region fallthrough
CT: control target
= control target key end

     0   :  { %7 = vsyncpa [#allocation10], 0  ;;  %s1082_s0 = inlined_call_operand.hbm [shape: f32[8,32], index: 0, kind: input, shape index: {}]   ;;  %s1083_s1 = inlined_call_operand.hbm [shape: f32[3,8,32], index: 1, kind: input, shape index: {}]   ;;  %s1084_s2 = inlined_call_operand.hbm [shape: f32[1,1], index: 2, kind: output, shape index: {}]  }
   0x1   :  { %8 = vsyncpa [#allocation13], 0 }
   0x2   :  { %10 = vsyncpa [#allocation13 + $0x1], 0 }
   0x3   :  { %11 = vsyncpa [#allocation11], 0  ;;  %s851_s9 = smov 0   ;;  %s853_s10 = smov 0  }
   0x4   :  { %s855_s11 = smov 0   ;;  %s857_s12 = smov 0  }
   0x5   :  { %s859_s13 = smov 0   ;;  %s861_s14 = smov 0  }
   0x6   :  { %s863_s15 = smov 0   ;;  %s865_s16 = smov 0  }
   0x7 LB: > { %s522_s17 = sadd.s32 4294967295, %s828_s16   ;;  %p84_p0 = scmp.ne.s32.totalorder %s804_s10, %s800_s9  ;;  %s828_s16 = sphi %s865_s16, %s17_s16   ;;  %s824_s15 = sphi %s863_s15, %s1104_s15   ;;  %s820_s14 = sphi %s861_s14, %s1103_s14   ;;  %s816_s13 = sphi %s859_s13, %s1102_s13   ;;  %s812_s12 = sphi %s857_s12, %s1101_s12   ;;  %s808_s11 = sphi %s855_s11, %s1100_s11   ;;  %s804_s10 = sphi %s853_s10, %s1099_s10   ;;  %s800_s9 = sphi %s851_s9, %s1098_s9  }
   0x8   : > { %p893_p1 = scmp.eq.s32.totalorder %s522_s17, 0  ;;  %p523_p2 = scmp.ge.s32.totalorder %s828_s16, 1 }
   0x9   : > { %p116_p3 = scmp.lt.s32.totalorder %s828_s16, 7  ;;  %s830_s21 = smov [#allocation9]  }
   0xa   : > { %s1089_s18 = scalar_select %p893_p1, 1, 0 }
   0xb   : > { %p901_p4 = por %p893_p1, %p84_p0  ;;  %p905_p5 = pnand %p523_p2, %p116_p3 }
   0xc   : > { %s131_s22 = sshll.u32 %s830_s21, 4  ;;  %s29_s24 = sadd.s32 1, %s820_s14  ;;  %s132_s22 = int_to_ptr.vmem [resolvable:$true] %s131_s22 }
   0xd   : > { %s1090_s19 = scalar_select %p901_p4, 1, 0 }
   0xe   : > { %s1091_s20 = scalar_select %p905_p5, 1, 0 }
   0xf   : > { %p563_p6 = pneg %p905_p5  ;;  %s670_s27 = scalar_lea.hbm %s1082_s0, 128 }
  0x10   : > { %p671_p8 = scmp.ne.s32.totalorder %s1082_s0, %s670_s27  ;;  %p677_p12 = scmp.lt.u32.totalorder %s670_s27, %s1082_s0 }
  0x11   : > { %p913_p7 = pnand %p563_p6, %p893_p1 }
  0x13   : > { %p672_p9 = pneg %p913_p7 }
  0x15   : > { %p673_p10 = pnand %p672_p9, %p671_p8 }
  0x17   : > { %p674_p11 = pneg %p673_p10 }
  0x19   : > { %p679_p13 = pnand %p677_p12, %p674_p11 }
  0x1b   : > { %682 = shalt.err (!%p679_p13)
}
  0x1c   : > { %s683_s4 = scalar_lea.vmem %s132_s22, 128  ;;  %p691_p6 = scmp.lt.s32.totalorder %s132_s22, %s132_s22 }
  0x1d   : > { %p684_p0 = scmp.ne.s32.totalorder %s132_s22, %s683_s4  ;;  %p692_p4 = scmp.lt.s32.totalorder %s683_s4, %s683_s4 }
  0x1f   : > { %p686_p2 = pnand %p684_p0, %p672_p9  ;;  %p693_p1 = por %p692_p4, %p691_p6 }
  0x21   : > { %p687_p3 = pneg %p686_p2 }
  0x23   : > { %p694_p5 = pnand %p693_p1, %p687_p3 }
  0x25   : > { %697 = shalt.err (!%p694_p5)
}
  0x26   : > { %566 = dma.hbm_to_vmem [thread:$0]  (!%p913_p7), %s1082_s0, 128, %s132_s22, [#allocation10]  }
  0x27   : > { %p30_p4 = scmp.ge.s32.totalorder %s29_s24, 3  ;;  %s36_s7 = sadd.s32 1, %s824_s15 }
  0x28   : > { %s71_s8 = sadd.s32 1, %s808_s11  ;;  %p78_p1 = scmp.ne.s32.totalorder %s808_s11, %s804_s10 }
  0x29   : > { %s1106_s24 = smov (%p30_p4, %s29_s24), 0  ;;  %s1108_s7 = smov (!%p30_p4, %s36_s7), %s824_s15 }
  0x2a   : > { %s66_s9 = ssub.s32 %s820_s14, %s1106_s24  ;;  %p79_p5 = scmp.eq.s32.totalorder %s828_s16, 0 }
  0x2b   : > { %p38_p8 = scmp.ge.s32.totalorder %s1108_s7, 2  ;;  %p69_p9 = scmp.eq.s32.totalorder %s66_s9, 0 }
  0x2c   : > { %p80_p10 = por %p79_p5, %p78_p1  ;;  %p572_p11 = scmp.lt.s32.totalorder %s828_s16, 6 }
  0x2d   : > { %s1110_s7 = smov (%p38_p8, %s1108_s7), 0  ;;  %s142_s22 = sand.u32 1, %s808_s11  }
  0x2e   : > { %s948_s21 = scalar_select %p69_p9, %s808_s11, %s71_s8  }
  0x2f   : > { %s527_s23 = sshll.u32 %s820_s14, 7  ;;  %s526_s25 = sshll.u32 %s142_s22, 3 }
  0x30   : > { %s955_s28 = scalar_lea.hbm %s1083_s1, %s527_s23  ;;  %s146_s29 = scalar_lea.vmem [#allocation12], %s526_s25 }
  0x31   : > { %s154_s30 = sshll.u32 %s146_s29, 4  ;;  %p957_p7 = pnand %p572_p11, %p80_p10  ;;  %s961_s30 = int_to_ptr.vmem [resolvable:$true] %s154_s30 }
  0x32   : > { %s143_s4 = scalar_lea.sflag [#allocation13], %s142_s22  ;;  %s698_s5 = scalar_lea.hbm %s955_s28, 128 }
  0x33   : > { %p699_p12 = scmp.ne.s32.totalorder %s955_s28, %s698_s5  ;;  %p700_p13 = pneg %p957_p7 }
  0x34   : > { %s703_s9 = scalar_lea.hbm %s1083_s1, 384  ;;  %p704_p3 = scmp.lt.u32.totalorder %s955_s28, %s1083_s1 }
  0x35   : > { %p701_p0 = pnand %p700_p13, %p699_p12  ;;  %p705_p6 = scmp.lt.u32.totalorder %s703_s9, %s698_s5 }
  0x36   : > { %p707_p1 = scmp.lt.u32.totalorder %s698_s5, %s955_s28 }
  0x37   : > { %p702_p2 = pneg %p701_p0  ;;  %p706_p4 = por %p705_p6, %p704_p3 }
  0x39   : > { %p708_p5 = por %p707_p1, %p706_p4 }
  0x3b   : > { %p709_p8 = pnand %p708_p5, %p702_p2 }
  0x3d   : > { %712 = shalt.err (!%p709_p8)
}
  0x3e   : > { %s713_s22 = scalar_lea.vmem %s961_s30, 128  ;;  %s831_s26 = smov [#allocation12]  }
  0x3f   : > { %p714_p9 = scmp.ne.s32.totalorder %s961_s30, %s713_s22  ;;  %s718_s27 = sshll.u32 %s831_s26, 4  ;;  %s719_s27 = int_to_ptr.vmem [resolvable:$false] %s718_s27 }
  0x40   : > { %s720_s29 = scalar_lea.vmem %s719_s27, 256  ;;  %p721_p12 = scmp.lt.s32.totalorder %s961_s30, %s719_s27 }
  0x41   : > { %p716_p10 = pnand %p714_p9, %p700_p13  ;;  %p722_p0 = scmp.lt.s32.totalorder %s720_s29, %s713_s22 }
  0x43   : > { %p717_p11 = pneg %p716_p10  ;;  %p723_p3 = por %p722_p0, %p721_p12 }
  0x45   : > { %p724_p6 = pnand %p723_p3, %p717_p11 }
  0x47   : > { %727 = shalt.err (!%p724_p6)
}
  0x48   : > { %570 = dma.hbm_to_vmem [thread:$0]  (!%p957_p7), %s955_s28, 128, %s961_s30, %s143_s4  }
  0x49   : > { %p1094_p2 = scmp.ne.s32.totalorder %s1091_s20, 0 }
  0x4a   : > { %p1095_p13 = scmp.ne.s32.totalorder (!%p1094_p2), %s1089_s18, 0 }
  0x4b   : > { %163 = sbr.rel (%p1094_p2) target bundleno = 2182 (0x886), region = 28 }
  0x52   : > { %787 = dma.done.wait (%p1095_p13), [#allocation10], 128  }
  0x53   : > { %789 = vsyncadd (%p1095_p13), [#allocation10], 4294967168  ;;  %s169_s5 = sand.u32 1, %s804_s10   ;;  %p1096_p4 = scmp.ne.s32.totalorder %s1090_s19, 0 }
  0x54   : > { %s995_s6 = sshll.u32 %s169_s5, 3  ;;  %s170_s8 = scalar_lea.sflag [#allocation13], %s169_s5 }
  0x55   : > { %s173_s3 = scalar_lea.vmem [#allocation12], %s995_s6 }
  0x56   : > { %791 = dma.done.wait (%p1096_p4), %s170_s8, 128  }
  0x57   : > { %793 = vsyncadd (%p1096_p4), %s170_s8, 4294967168  ;;  %p531_p7 = scmp.ne.s32.totalorder %s816_s13, 0 }
  0x58   : > { %p194_p1 = scmp.eq.s32.totalorder (!%p531_p7), %s812_s12, 0 }
  0x59   : > { %192 = sbr.rel (%p531_p7) target bundleno = 1148 (0x47c), region = 40 }
  0x60   : > { %198 = sbr.rel (!%p194_p1) target bundleno = 103 (0x67), region = 44  ;;  %vm199_vm0 = vcmask (%p194_p1), 253952   ;;  %vm204_vm1 = vcmask (%p194_p1), 0   ;;  %v832_v0 = vmov (%p194_p1), 0.0  }
  0x61   : > { %200 = vst.msk [vmem:[#allocation2] sm:$0x1] (%p194_p1), %vm199_vm0, %v832_v0  ;;  %201 = vst.msk [vmem:[#allocation3] sm:$0x1] (%p194_p1), %vm199_vm0, %v832_v0 }
  0x62   : > { %202 = vst.msk [vmem:[#allocation3 + $0x1] sm:$0x1] (%p194_p1), %vm199_vm0, %v832_v0  ;;  %203 = vst.msk [vmem:[#allocation3 + $0x2] sm:$0x1] (%p194_p1), %vm199_vm0, %v832_v0 }
  0x63   : > { %205 = vst.msk [vmem:[#allocation8] sm:$0x1] (%p194_p1), %vm204_vm1, %v832_v0 }
  0x67 PF: > { %p533_p5 = scmp.ne.s32.totalorder %s812_s12, 0 }
  0x68   : > { %v209_v1 = vld [vmem:[#allocation9] sm:$0xff] (!%p533_p5)  ;;  %vm211_vm2 = vcmask (!%p533_p5), 261120   ;;  %vm227_vm3 = vcmask (!%p533_p5), 253952  }
  0x69   : > { %208 = sbr.rel (%p533_p5) target bundleno = 281 (0x119), region = 48  ;;  %v210_v2 = vmul.f32 (!%p533_p5), %v209_v1, %v209_v1  ;;  %v218_v14 = vld [vmem:[#allocation2] sm:$0x1] (!%p533_p5) }
  0x6b   : > { %v212_v3 = vsel (!%p533_p5), %vm211_vm2, %v210_v2, 0.0 }
  0x6c   : > { %213 = vadd.xlane.f32.xlu0 (!%p533_p5), %v212_v3 }
  0xf9   : > { %v214_v4 = vpop.xlane.xlu0 %213 }
  0xfa   : > { %v215_v5 = vmax.f32 %v214_v4, 1e-24 }
  0xfc   : > { %645 = vrsqrt.f32 %v215_v5 }
 0x106   : > { %v646_v6 = vpop.eup %645 }
 0x107   : > { %v217_v7 = vmul.f32 %v646_v6, %v209_v1 }
 0x109   : > { %v219_v8 = vsel %vm211_vm2, %v217_v7, 0.0 }
 0x10a   : > { %v220_v9 = vrot.slane %v219_v8, 4 }
 0x10c   : > { %v221_v10 = vadd.f32 %v220_v9, %v219_v8 }
 0x10e   : > { %v222_v11 = vrot.slane %v221_v10, 2 }
 0x110   : > { %v223_v12 = vadd.f32 %v222_v11, %v221_v10 }
 0x112   : > { %v224_v13 = vrot.slane %v223_v12, 1 }
 0x114   : > { %v225_v15 = vadd.f32 %v224_v13, %v223_v12 }
 0x116   : > { %v226_v16 = vadd.f32 %v225_v15, %v218_v14 }
 0x118   : > { %228 = vst.msk [vmem:[#allocation2] sm:$0x1] %vm227_vm3, %v226_v16 }
 0x119 PF: > { %v229_v17 = vld [vmem:[%s173_s3] sm:$0xff]  ;;  %vm231_vm4 = vcmask 261120   ;;  %p250_p8 = scmp.eq.s32.totalorder %s812_s12, 2  ;;  %s238_s18 = scalar_lea.vmem [#allocation3], %s812_s12  ;;  %vm248_vm5 = vcmask 253952  }
 0x11a   : > { %v230_v18 = vmul.f32 %v229_v17, %v229_v17  ;;  %v239_v30 = vld [vmem:[%s238_s18] sm:$0x1]  ;;  %vm274_vm6 = vcmask (%p250_p8), 0   ;;  %vm294_vm7 = vcmask (%p250_p8), 1040384  }
 0x11c   : > { %v232_v19 = vsel %vm231_vm4, %v230_v18, 0.0 }
 0x11d   : > { %233 = vadd.xlane.f32.xlu0 %v232_v19 }
 0x11f   : > { %v255_v33 = vld [vmem:[#allocation2] sm:$0x1] (%p250_p8) }
 0x1aa   : > { %v234_v20 = vpop.xlane.xlu0 %233 }
 0x1ab   : > { %v235_v21 = vmax.f32 %v234_v20, 1e-24 }
 0x1ad   : > { %647 = vrsqrt.f32 %v235_v21 }
 0x1b7   : > { %v648_v22 = vpop.eup %647 }
 0x1b8   : > { %v237_v23 = vmul.f32 %v648_v22, %v229_v17 }
 0x1ba   : > { %v240_v24 = vsel %vm231_vm4, %v237_v23, 0.0 }
 0x1bb   : > { %v241_v25 = vrot.slane %v240_v24, 4 }
 0x1bd   : > { %v242_v26 = vadd.f32 %v241_v25, %v240_v24 }
 0x1bf   : > { %v243_v27 = vrot.slane %v242_v26, 2 }
 0x1c1   : > { %v244_v28 = vadd.f32 %v243_v27, %v242_v26 }
 0x1c3   : > { %v245_v29 = vrot.slane %v244_v28, 1  ;;  %254 = sbr.rel (!%p250_p8) target bundleno = 1148 (0x47c), region = 52 }
 0x1c5   : > { %v246_v31 = vadd.f32 %v245_v29, %v244_v28 }
 0x1c7   : > { %v247_v32 = vadd.f32 %v246_v31, %v239_v30 }
 0x1c9   : > { %249 = vst.msk [vmem:[%s238_s18] sm:$0x1] %vm248_vm5, %v247_v32 }
 0x1d0   : > { %v256_v34 = vld [vmem:[#allocation3] sm:$0x1]  ;;  %v257_v35 = vld [vmem:[#allocation3 + $0x1] sm:$0x1]  ;;  %v258_v38 = vld [vmem:[#allocation3 + $0x2] sm:$0x1] }
 0x1d1   : > { %v259_v36 = vmul.f32 %v256_v34, %v255_v33  ;;  %v260_v37 = vmul.f32 %v257_v35, %v255_v33  ;;  %v261_v39 = vmul.f32 %v258_v38, %v255_v33 }
 0x1d3   : > { %v262_v40 = vsel %vm248_vm5, %v259_v36, 0.0  ;;  %v268_v41 = vsel %vm248_vm5, %v261_v39, 0.0  ;;  %v265_v42 = vsel %vm248_vm5, %v260_v37, 0.0 }
 0x1d4   : > { %263 = vadd.xlane.f32.xlu0 %v262_v40  ;;  %269 = vadd.xlane.f32.xlu1 %v268_v41 }
 0x1d8   : > { %266 = vadd.xlane.f32.xlu0 %v265_v42 }
 0x261   : > { %v264_v43 = vpop.xlane.xlu0 %263  ;;  %v270_v44 = vpop.xlane.xlu1 %269 }
 0x262   : > { %v271_v45 = vmul.f32 0.015625, %v264_v43  ;;  %v273_v46 = vmul.f32 0.015625, %v270_v44 }
 0x264   : > { %v275_v49 = vsel %vm274_vm6, %v271_v45, 0.0  ;;  %v278_v51 = vsel %vm274_vm6, %v273_v46, 0.0 }
 0x265   : > { %v267_v47 = vpop.xlane.xlu0 %266 }
 0x266   : > { %v272_v48 = vmul.f32 0.015625, %v267_v47 }
 0x268   : > { %v276_v50 = vsel %vm274_vm6, %v272_v48, 0.0 }
 0x269   : > { %v277_v52 = vadd.f32 %v276_v50, %v275_v49 }
 0x26b   : > { %v279_v53 = vadd.f32 %v278_v51, %v277_v52 }
 0x26d   : > { %280 = vadd.xlane.f32.xlu1 %v279_v53 }
 0x2fa   : > { %v281_v54 = vpop.xlane.xlu1 %280 }
 0x2fb   : > { %v282_v55 = vrot.slane %v281_v54, 4 }
 0x2fd   : > { %v283_v56 = vadd.f32 %v282_v55, %v281_v54 }
 0x2ff   : > { %v284_v57 = vrot.slane %v283_v56, 2 }
 0x301   : > { %v285_v58 = vadd.f32 %v284_v57, %v283_v56 }
 0x303   : > { %v286_v59 = vrot.slane %v285_v58, 1 }
 0x305   : > { %v287_v60 = vadd.f32 %v286_v59, %v285_v58 }
 0x307   : > { %545 = vpush %v287_v60 }
 0x338   : > { %s546_s19 = spop %545 }
 0x339   : > { %v289_v61 = vstv %s546_s19 }
 0x33a   : > { %649 = vrcp.f32 %v289_v61 }
 0x344   : > { %v650_v62 = vpop.eup %649 }
 0x345   : > { %v291_v63 = vmul.f32 %v650_v62, %v271_v45  ;;  %v292_v0 = vmul.f32 %v650_v62, %v272_v48  ;;  %v293_v1 = vmul.f32 %v650_v62, %v273_v46 }
 0x347   : > { %v295_v2 = vsel %vm294_vm7, %v291_v63, -inf  ;;  %v296_v3 = vsel %vm294_vm7, %v292_v0, -inf  ;;  %v297_v5 = vsel %vm294_vm7, %v293_v1, -inf }
 0x348   : > { %v298_v4 = vmax.f32 %v295_v2, %v296_v3 }
 0x34a   : > { %v299_v6 = vmax.f32 %v298_v4, %v297_v5 }
 0x34c   : > { %v300_v7 = vrot.slane %v299_v6, 4 }
 0x34e   : > { %v301_v8 = vmax.f32 %v299_v6, %v300_v7 }
 0x350   : > { %v302_v9 = vrot.slane %v301_v8, 2 }
 0x352   : > { %v303_v10 = vmax.f32 %v301_v8, %v302_v9 }
 0x354   : > { %v304_v11 = vrot.slane %v303_v10, 1 }
 0x356   : > { %v305_v12 = vmax.f32 %v303_v10, %v304_v11 }
 0x358   : > { %547 = vpush %v305_v12 }
 0x389   : > { %s548_s20 = spop %547 }
 0x38a   : > { %v307_v13 = vstv %s548_s20 }
 0x38b   : > { %v308_v14 = vsub.f32 %v291_v63, %v307_v13  ;;  %v309_v15 = vsub.f32 %v292_v0, %v307_v13  ;;  %v310_v16 = vsub.f32 %v293_v1, %v307_v13 }
 0x38d   : > { %v311_v17 = vmul.f32 1.442695, %v308_v14  ;;  %v313_v18 = vmul.f32 1.442695, %v309_v15  ;;  %v315_v19 = vmul.f32 1.442695, %v310_v16 }
 0x38f   : > { %651 = vpow2.f32 %v311_v17 }
 0x390   : > { %653 = vpow2.f32 %v313_v18 }
 0x391   : > { %655 = vpow2.f32 %v315_v19 }
 0x399   : > { %v652_v20 = vpop.eup %651 }
 0x39a   : > { %v654_v21 = vpop.eup %653  ;;  %v317_v22 = vsel %vm274_vm6, %v652_v20, 0.0 }
 0x39b   : > { %v656_v23 = vpop.eup %655  ;;  %v318_v24 = vsel %vm274_vm6, %v654_v21, 0.0 }
 0x39c   : > { %v319_v25 = vadd.f32 %v318_v24, %v317_v22  ;;  %v320_v26 = vsel %vm274_vm6, %v656_v23, 0.0 }
 0x39e   : > { %v321_v27 = vadd.f32 %v320_v26, %v319_v25 }
 0x3a0   : > { %322 = vadd.xlane.f32.xlu0 %v321_v27 }
 0x42d   : > { %v323_v28 = vpop.xlane.xlu0 %322 }
 0x42e   : > { %v324_v29 = vrot.slane %v323_v28, 4 }
 0x430   : > { %v325_v30 = vadd.f32 %v324_v29, %v323_v28 }
 0x432   : > { %v326_v31 = vrot.slane %v325_v30, 2 }
 0x434   : > { %v327_v32 = vadd.f32 %v326_v31, %v325_v30 }
 0x436   : > { %v328_v33 = vrot.slane %v327_v32, 1 }
 0x438   : > { %v329_v34 = vadd.f32 %v328_v33, %v327_v32 }
 0x43a   : > { %549 = vpush %v329_v34 }
 0x46b   : > { %s550_s28 = spop %549 }
 0x46c   : > { %v331_v35 = vstv %s550_s28 }
 0x46d   : > { %657 = vrcp.f32 %v331_v35 }
 0x477   : > { %v658_v36 = vpop.eup %657 }
 0x478   : > { %v333_v37 = vmul.f32 %v658_v36, %v652_v20  ;;  %v334_v38 = vmul.f32 %v658_v36, %v654_v21  ;;  %v335_v39 = vmul.f32 %v658_v36, %v656_v23 }
 0x47a   : > { %336 = vst.msk [vmem:[#allocation4] sm:$0x1] %vm274_vm6, %v333_v37  ;;  %337 = vst.msk [vmem:[#allocation4 + $0x1] sm:$0x1] %vm274_vm6, %v334_v38 }
 0x47b   : > { %338 = vst.msk [vmem:[#allocation4 + $0x2] sm:$0x1] %vm274_vm6, %v335_v39 }
 0x47c PF: > { %p535_p9 = scmp.ne.s32.totalorder %s816_s13, 1 }
 0x47d   : > { %p536_p10 = scmp.ne.s32.totalorder (!%p535_p9), %s812_s12, 0 }
 0x47e   : > { %342 = sbr.rel (%p535_p9) target bundleno = 2157 (0x86d), region = 56 }
 0x485   : > { %346 = sbr.rel (%p536_p10) target bundleno = 1475 (0x5c3), region = 60  ;;  %v347_v40 = vld [vmem:[#allocation9] sm:$0xff] (!%p536_p10)  ;;  %vm349_vm8 = vcmask (!%p536_p10), 261120   ;;  %v833_v42 = vmov (!%p536_p10), 0.0   ;;  %vm362_vm9 = vcmask (!%p536_p10), 7168  }
 0x486   : > { %v348_v41 = vmul.f32 (!%p536_p10), 0.5, %v347_v40  ;;  %364 = vst.msk [vmem:[#allocation7] sm:$0xff] (!%p536_p10), %vm349_vm8, %v833_v42 }
 0x488   : > { %v350_v43 = vsel (!%p536_p10), %vm349_vm8, %v348_v41, -inf }
 0x489   : > { %351 = vmax.xlane.f32.xlu0 (!%p536_p10), %v350_v43 }
 0x516   : > { %v352_v44 = vpop.xlane.xlu0 %351 }
 0x517   : > { %v353_v45 = vsub.f32 %v348_v41, %v352_v44 }
 0x519   : > { %354 = vst.msk [vmem:[#allocation5] sm:$0xff] %vm349_vm8, %v353_v45  ;;  %v355_v46 = vmul.f32 1.442695, %v353_v45 }
 0x51b   : > { %659 = vpow2.f32 %v355_v46 }
 0x525   : > { %v660_v47 = vpop.eup %659 }
 0x526   : > { %v357_v48 = vsel %vm349_vm8, %v660_v47, 0.0 }
 0x527   : > { %358 = vadd.xlane.f32.xlu0 %v357_v48 }
 0x5b4   : > { %v359_v49 = vpop.xlane.xlu0 %358 }
 0x5b5   : > { %661 = vlog2.f32 %v359_v49 }
 0x5bf   : > { %v662_v50 = vpop.eup %661 }
 0x5c0   : > { %v361_v51 = vmul.f32 0.6931472, %v662_v50 }
 0x5c2   : > { %363 = vst.msk [vmem:[#allocation6] sm:$0xff] %vm362_vm9, %v361_v51 }
 0x5c3 PF: > { %v834_v52 = vmov 0   ;;  %s366_s13 = scalar_lea.vmem [#allocation4], %s812_s12  ;;  %v368_v54 = vld [vmem:[%s173_s3] sm:$0xff]  ;;  %vm380_vm10 = vcmask 261120   ;;  %p538_p11 = scmp.ne.s32.totalorder %s812_s12, 2 }
 0x5c4   : > { %663 = vset.pattern.permute.xlu0 %v834_v52  ;;  %v537_v53 = vld [vmem:[%s366_s13] ss:$0 sm:$0xff]  ;;  %v365_v56 = vld [vmem:[#allocation7] sm:$0xff]  ;;  %v397_v1 = vld [vmem:[#allocation5] sm:$0xff] (!%p538_p11)  ;;  %vm411_vm11 = vcmask (!%p538_p11), 7168   ;;  %vm424_vm12 = vcmask (!%p538_p11), 0  }
 0x5c5   : > { %375 = vperm.xlu0 %663, %v537_v53   ;;  %v410_v24 = vld [vmem:[#allocation8] sm:$0x1] (!%p538_p11) }
 0x5c9   : > { %v405_v10 = vld [vmem:[#allocation6] sm:$0xff] (!%p538_p11) }
 0x643   : > { %385 = sbr.rel (%p538_p11) target bundleno = 2157 (0x86d), region = 64 }
 0x644   : > { %v376_v55 = vpop.permute.xlu0 %375 }
 0x645   : > { %v378_v57 = vmul.f32 %v376_v55, %v368_v54 }
 0x647   : > { %v379_v58 = vadd.f32 %v378_v57, %v365_v56 }
 0x649   : > { %381 = vst.msk [vmem:[#allocation7] sm:$0xff] %vm380_vm10, %v379_v58 }
 0x650   : > { %v386_v59 = vld [vmem:[#allocation7] sm:$0xff] }
 0x651   : > { %v387_v60 = vmul.f32 0.5, %v386_v59 }
 0x653   : > { %v388_v61 = vsel %vm380_vm10, %v387_v60, -inf }
 0x654   : > { %389 = vmax.xlane.f32.xlu0 %v388_v61 }
 0x6e1   : > { %v390_v62 = vpop.xlane.xlu0 %389 }
 0x6e2   : > { %v391_v63 = vsub.f32 %v387_v60, %v390_v62 }
 0x6e4   : > { %v392_v0 = vmul.f32 1.442695, %v391_v63  ;;  %v398_v2 = vsub.f32 %v391_v63, %v397_v1 }
 0x6e6   : > { %664 = vpow2.f32 %v392_v0 }
 0x6f0   : > { %v665_v3 = vpop.eup %664 }
 0x6f1   : > { %v394_v4 = vsel %vm380_vm10, %v665_v3, 0.0  ;;  %v399_v5 = vmul.f32 %v665_v3, %v398_v2 }
 0x6f2   : > { %395 = vadd.xlane.f32.xlu0 %v394_v4 }
 0x6f3   : > { %v400_v6 = vsel %vm380_vm10, %v399_v5, 0.0 }
 0x6f4   : > { %401 = vadd.xlane.f32.xlu1 %v400_v6 }
 0x77f   : > { %v396_v7 = vpop.xlane.xlu0 %395 }
 0x780   : > { %666 = vrcp.f32 %v396_v7 }
 0x781   : > { %668 = vlog2.f32 %v396_v7  ;;  %v402_v12 = vpop.xlane.xlu1 %401 }
 0x78a   : > { %v667_v8 = vpop.eup %666 }
 0x78b   : > { %v669_v9 = vpop.eup %668  ;;  %v404_v13 = vmul.f32 %v667_v8, %v402_v12 }
 0x78c   : > { %v407_v11 = vmul.f32 0.6931472, %v669_v9 }
 0x78e   : > { %v408_v14 = vsub.f32 %v405_v10, %v407_v11 }
 0x790   : > { %v409_v15 = vadd.f32 %v408_v14, %v404_v13 }
 0x792   : > { %v412_v16 = vsel %vm411_vm11, %v409_v15, 0.0 }
 0x793   : > { %413 = vadd.xlane.f32.xlu1 %v412_v16 }
 0x820   : > { %v414_v17 = vpop.xlane.xlu1 %413 }
 0x821   : > { %v415_v18 = vrot.slane %v414_v17, 4 }
 0x823   : > { %v416_v19 = vadd.f32 %v415_v18, %v414_v17 }
 0x825   : > { %v417_v20 = vrot.slane %v416_v19, 2 }
 0x827   : > { %v418_v21 = vadd.f32 %v417_v20, %v416_v19 }
 0x829   : > { %v419_v22 = vrot.slane %v418_v21, 1 }
 0x82b   : > { %v420_v23 = vadd.f32 %v419_v22, %v418_v21 }
 0x82d   : > { %551 = vpush %v420_v23 }
 0x85e   : > { %s552_s12 = spop %551 }
 0x85f   : > { %v422_v25 = vstv %s552_s12 }
 0x860   : > { %v423_v26 = vadd.f32 %v422_v25, %v410_v24 }
 0x862   : > { %425 = vst.msk [vmem:[#allocation8] sm:$0x1] %vm424_vm12, %v423_v26 }
 0x869   : > { %v430_v27 = vld [vmem:[#allocation8] sm:$0x1] }
 0x86a   : > { %v431_v28 = vmul.f32 0.5, %v430_v27 }
 0x86c   : > { %432 = vst.msk [vmem:[#allocation14] sm:$0x1] %vm424_vm12, %v431_v28 }
 0x86d PF: > { %p1032_p12 = scmp.eq.s32.totalorder %s522_s17, 5  ;;  %s835_s4 = smov [#allocation14]  }
 0x86e   : > { %s440_s9 = sshll.u32 %s835_s4, 4  ;;  %s441_s9 = int_to_ptr.vmem [resolvable:$true] %s440_s9 }
 0x86f   : > { %s728_s23 = scalar_lea.vmem %s441_s9, 16  ;;  %s734_s25 = scalar_lea.vmem %s441_s9, 32 }
 0x870   : > { %p729_p0 = scmp.ne.s32.totalorder %s441_s9, %s728_s23  ;;  %p735_p2 = scmp.lt.s32.totalorder %s441_s9, %s441_s9 }
 0x871   : > { %p736_p13 = scmp.lt.s32.totalorder %s734_s25, %s728_s23 }
 0x872   : > { %p730_p3 = pnand %p729_p0, %p1032_p12 }
 0x873   : > { %p737_p4 = por %p736_p13, %p735_p2 }
 0x874   : > { %p731_p6 = pneg %p730_p3 }
 0x876   : > { %p738_p7 = pnand %p737_p4, %p731_p6 }
 0x878   : > { %741 = shalt.err (!%p738_p7)
}
 0x879   : > { %s742_s26 = scalar_lea.hbm %s1084_s2, 16 }
 0x87a   : > { %p743_p1 = scmp.ne.s32.totalorder %s1084_s2, %s742_s26  ;;  %p748_p9 = scmp.lt.u32.totalorder %s742_s26, %s1084_s2 }
 0x87c   : > { %p744_p5 = pnand %p743_p1, %p1032_p12 }
 0x87e   : > { %p745_p8 = pneg %p744_p5 }
 0x880   : > { %p750_p10 = pnand %p748_p9, %p745_p8 }
 0x882   : > { %753 = shalt.err (!%p750_p10)
}
 0x883   : > { %560 = dma.vmem_to_hbm [thread:$0]  (%p1032_p12), %s441_s9, 16, %s1084_s2, [#allocation11]  }
 0x884   : > { %795 = dma.done.wait (%p1032_p12), [#allocation11], 16  }
 0x885   : > { %797 = vsyncadd (%p1032_p12), [#allocation11], 4294967280 }
 0x886 PF: > { %s17_s16 = sadd.s32 1, %s828_s16   ;;  %s1098_s9 = smov %s804_s10 }
 0x887   : > { %p14_p11 = scmp.ge.s32.totalorder %s17_s16, 8   ;;  %s1099_s10 = smov %s808_s11 }
 0x888   : > { %s1100_s11 = smov %s948_s21  ;;  %s1101_s12 = smov %s820_s14 }
 0x889   : > { %s1102_s13 = smov %s824_s15  ;;  %s1103_s14 = smov %s1106_s24 }
 0x88a   : > { %s1104_s15 = smov %s1110_s7  ;;  %16 = sbr.rel (!%p14_p11) target bundleno = 7 (0x7), region = 105 }
 0x891   :  { %453 = vsyncpa [#allocation10], 1 }
 0x892   :  { %455 = vsyncpa [#allocation10 + $0x1], 1 }
 0x893   :  { %456 = vsyncpa [#allocation13], 1 }
 0x894   :  { %458 = vsyncpa [#allocation13 + $0x1], 1 }
 0x895   :  { %459 = vsyncpa [#allocation11], 1 }
 0x896   :  { %461 = vsyncpa [#allocation11 + $0x1], 1 }

</bundles_post_ra>
